<compile_context>
chip_gen: v5e
topology: v5e:2x2
jax: 0.10.0
libtpu: 0.0.40
codegen_flags: <defaults>
</compile_context>

<pallas_src>
from functools import partial

import numpy as np

import jax
import jax.numpy as jnp
from jax.experimental import pallas as pl
from jax.experimental.pallas import tpu as pltpu


def _round_up(x, m):
    return (x + m - 1) // m * m


def _pick_tile(total, cands):
    for c in cands:
        if c <= total and total % c == 0:
            return c
    return cands[-1]


_VMEM_LIMIT = None


def _vmem_limit_bytes():
    """Per-generation scoped-VMEM budget (v5e/v6e: 64 MiB, v7x: 32 MiB)."""
    global _VMEM_LIMIT
    if _VMEM_LIMIT is None:
        cap = 64 * 1024 * 1024  # conservative fallback (v7x physical VMEM)
        try:
            cap = int(pltpu.get_tpu_info().vmem_capacity_bytes)
        except Exception:
            pass
        _VMEM_LIMIT = int(min(cap // 2, 96 * 1024 * 1024))
    return _VMEM_LIMIT


# ---------------------------------------------------------------------------
# Kernel 1: dilated conv1d (symmetric padding, like nn.Conv1d with
# padding=(K-1)*dilation) fused with leaky_relu.  Channels-first layout,
# in-kernel zero padding of the time axis, K accumulated MXU matmuls,
# lane-dense bf16 output.
# ---------------------------------------------------------------------------
def _conv_lrelu_kernel(x_ref, w_ref, b_ref, o_ref, xpad_ref, *,
                       dilation, ksize, lin, pad):
    # x_ref:    (Cin, L_arr)        raw (unpadded) input slab for this batch
    # w_ref:    (K, Cout, Cin_p8)   bf16 weights, Cin zero-padded to mult of 8
    # b_ref:    (Cout, 1)           f32 bias
    # o_ref:    (Cout, Lout_p)      bf16 output (time padded to 128 multiple)
    # xpad_ref: (Cin_p8, Lsc)       bf16 scratch holding the zero-padded input
    cin = x_ref.shape[0]
    lout_p = o_ref.shape[1]

    # In-kernel symmetric zero padding (replaces the XLA jnp.pad HBM pass).
    xpad_ref[...] = jnp.zeros_like(xpad_ref)
    xpad_ref[0:cin, pad:pad + lin] = x_ref[0:cin, 0:lin].astype(xpad_ref.dtype)

    # K accumulated matmuls against static weight slices -- no lane-axis
    # im2col concatenate, all slice starts are static (k * dilation).
    acc = jnp.zeros((o_ref.shape[0], lout_p), jnp.float32)
    for k in range(ksize):
        s = k * dilation
        acc = acc + jnp.dot(w_ref[k], xpad_ref[:, s:s + lout_p],
                            preferred_element_type=jnp.float32)

    y = acc + b_ref[...]                                  # f32 epilogue
    # F.leaky_relu default negative_slope = 0.01; store bf16 (lane-dense).
    o_ref[...] = jnp.where(y >= 0.0, y, 0.01 * y).astype(o_ref.dtype)


def causal_conv1d_lrelu(x, w, b, dilation, ksize, lin=None):
    """x: (B, Cin, L_arr) with real length `lin`; w: (K, Cout, Cin_p8) bf16;
    b: (Cout, 1) f32  ->  (B, Cout, Lout_p) bf16 (real output length lin+pad)."""
    B, cin, l_arr = x.shape
    if lin is None:
        lin = l_arr
    k_, cout, cin_p8 = w.shape
    assert k_ == ksize and cin_p8 >= cin

    pad = (ksize - 1) * dilation
    lout = lin + pad                       # Conv1d with padding=pad on both sides
    lout_p = _round_up(lout, 128)          # lane-dense output slab
    lsc = _round_up(lout_p + pad, 128)     # padded-input scratch length

    kern = partial(_conv_lrelu_kernel, dilation=dilation, ksize=ksize,
                   lin=lin, pad=pad)
    out = pl.pallas_call(
        kern,
        out_shape=jax.ShapeDtypeStruct((B, cout, lout_p), jnp.bfloat16),
        grid_spec=pltpu.PrefetchScalarGridSpec(
            num_scalar_prefetch=0,
            grid=(B,),
            in_specs=[
                pl.BlockSpec((None, cin, l_arr), lambda bb: (bb, 0, 0)),
                pl.BlockSpec((ksize, cout, cin_p8), lambda bb: (0, 0, 0)),
                pl.BlockSpec((cout, 1), lambda bb: (0, 0)),
            ],
            out_specs=pl.BlockSpec((None, cout, lout_p), lambda bb: (bb, 0, 0)),
            scratch_shapes=[pltpu.VMEM((cin_p8, lsc), jnp.bfloat16)],
        ),
        compiler_params=pltpu.CompilerParams(
            dimension_semantics=("parallel",),
            vmem_limit_bytes=_vmem_limit_bytes(),
        ),
    )(x, w, b)
    return out


# ---------------------------------------------------------------------------
# Kernel 2: dense readout (the nn.Linear at the end) -- tiled matmul with an
# f32 accumulator scratch, bf16 operands, lane-dense (128-multiple) output.
# ---------------------------------------------------------------------------
def _dense_kernel(x_ref, w_ref, b_ref, o_ref, acc_ref):
    @pl.when(pl.program_id(2) == 0)
    def _():
        acc_ref[...] = jnp.zeros_like(acc_ref)

    acc_ref[...] += jnp.dot(x_ref[...], w_ref[...],
                            preferred_element_type=jnp.float32)

    @pl.when(pl.program_id(2) == pl.num_programs(2) - 1)
    def _():
        o_ref[...] = acc_ref[...] + b_ref[...]


def dense(h, w, b):
    """h: (B, K) bf16, w: (K, N) bf16, b: (1, N) f32 -> (B, N) f32."""
    B, kdim = h.shape
    kw, n = w.shape
    assert kw == kdim, f"dense K mismatch: {kw} vs {kdim}"
    if h.dtype != jnp.bfloat16:
        h = h.astype(jnp.bfloat16)

    mp = _round_up(B, 8)
    tm = _pick_tile(mp, (128, 64, 32, 16, 8))
    np_ = _round_up(n, 128)
    tn = _pick_tile(np_, (512, 256, 128))
    kp = _round_up(kdim, 128)
    tk = _pick_tile(kp, (2048, 1024, 512, 256, 128))

    if mp != B or kp != kdim:
        h = jnp.pad(h, ((0, mp - B), (0, kp - kdim)))
    if kp != kdim or np_ != n:
        w = jnp.pad(w, ((0, kp - kdim), (0, np_ - n)))
        b = jnp.pad(b, ((0, 0), (0, np_ - n)))

    out = pl.pallas_call(
        _dense_kernel,
        out_shape=jax.ShapeDtypeStruct((mp, np_), jnp.float32),
        grid_spec=pltpu.PrefetchScalarGridSpec(
            num_scalar_prefetch=0,
            grid=(mp // tm, np_ // tn, kp // tk),
            in_specs=[
                pl.BlockSpec((tm, tk), lambda i, j, k: (i, k)),
                pl.BlockSpec((tk, tn), lambda i, j, k: (k, j)),
                pl.BlockSpec((1, tn), lambda i, j, k: (0, j)),
            ],
            out_specs=pl.BlockSpec((tm, tn), lambda i, j, k: (i, j)),
            scratch_shapes=[pltpu.VMEM((tm, tn), jnp.float32)],
        ),
        compiler_params=pltpu.CompilerParams(
            dimension_semantics=("parallel", "parallel", "arbitrary"),
            vmem_limit_bytes=_vmem_limit_bytes(),
        ),
    )(h, w, b)
    return out[:B, :n]


# ---------------------------------------------------------------------------
# Parameter init (deterministic, mirroring PyTorch default uniform bounds).
# Conv weights pre-folded to (K, Cout, Cin_p8) bf16; the Linear weight is
# row-permuted / zero-extended so it consumes the conv's time-padded
# channel-major flatten directly (transpose + narrow folded in).
# ---------------------------------------------------------------------------
def init_params(key, input_size, hidden_size, output_size, bptt,
                kernel_size, dilation, num_layers, seq_len=None):
    if seq_len is None:
        seq_len = bptt
    params = {"convs": [], "seq_len": seq_len, "ref": {"convs": []}}

    cin = input_size
    lin = seq_len
    for i in range(num_layers):
        d = dilation if i == 0 else 2
        key, k1, k2 = jax.random.split(key, 3)
        bound = 1.0 / (cin * kernel_size) ** 0.5
        # PyTorch Conv1d layout: (Cout, Cin, K)
        w_t = jax.random.uniform(
            k1, (hidden_size, cin, kernel_size), jnp.float32, -bound, bound)
        bc = jax.random.uniform(k2, (hidden_size,), jnp.float32, -bound, bound)

        cin_p8 = _round_up(cin, 8)
        w_folded = jnp.zeros((kernel_size, hidden_size, cin_p8), jnp.float32)
        w_folded = w_folded.at[:, :, :cin].set(jnp.transpose(w_t, (2, 0, 1)))
        params["convs"].append({
            "w": w_folded.astype(jnp.bfloat16),     # (K, Cout, Cin_p8)
            "b": bc.reshape(-1, 1),                 # (Cout, 1) f32
            "dilation": d,
            "ksize": kernel_size,
        })
        params["ref"]["convs"].append({"w": w_t, "b": bc, "dilation": d})
        lin = lin + (kernel_size - 1) * d           # PyTorch: Lout = Lin + pad
        cin = hidden_size

    lout_last = lin
    lout_p_last = _round_up(lout_last, 128)

    in_f = bptt * hidden_size
    out_f = bptt * output_size
    assert hidden_size * lout_last >= in_f, "narrow exceeds conv output length"

    key, k1, k2 = jax.random.split(key, 3)
    bound = 1.0 / in_f ** 0.5
    # PyTorch Linear layout: (out, in)
    w_out = jax.random.uniform(k1, (out_f, in_f), jnp.float32, -bound, bound)
    b_out = jax.random.uniform(k2, (out_f,), jnp.float32, -bound, bound)

    # Fold `view(B,-1)` (channel-major: k = c*Lout + l) + `narrow(1,0,in_f)`
    # into the weight: row j = c*Lout_p + l of the time-padded flatten picks
    # W^T[c*Lout + l] when l < Lout and c*Lout + l < in_f, else a zero row
    # (also zeroes the conv's garbage padded-time positions).
    c_idx = jnp.arange(hidden_size)[:, None]
    l_idx = jnp.arange(lout_p_last)[None, :]
    k_cm = c_idx * lout_last + l_idx
    valid = (l_idx < lout_last) & (k_cm < in_f)
    rows = jnp.where(valid, k_cm, 0).reshape(-1)
    w_lin_t = w_out.T                                           # (in_f, out_f)
    w_full = jnp.where(valid.reshape(-1)[:, None], w_lin_t[rows], 0.0)

    n_p = _round_up(out_f, 128)                                 # lane-dense N
    w_full = jnp.pad(w_full, ((0, 0), (0, n_p - out_f)))
    b_full = jnp.pad(b_out.reshape(1, -1), ((0, 0), (0, n_p - out_f)))
    params["out_w"] = w_full.astype(jnp.bfloat16)   # (hidden*Lout_p, N_p)
    params["out_b"] = b_full                        # (1, N_p) f32
    params["ref"]["out_w"] = w_out
    params["ref"]["out_b"] = b_out
    return params


# ---------------------------------------------------------------------------
# Forward pass (matches linear.forward semantics).
# ---------------------------------------------------------------------------
def linear_forward(params, x, bptt, hidden_size, output_size):
    B, T, _ = x.shape
    assert T == params["seq_len"], "sequence length must match init_params"

    h = jnp.transpose(x, (0, 2, 1))        # input.permute(0, 2, 1) -> (B, Cin, T)
    lin = T
    for layer in params["convs"]:
        h = causal_conv1d_lrelu(h, layer["w"], layer["b"],
                                layer["dilation"], layer["ksize"], lin=lin)
        lin = lin + (layer["ksize"] - 1) * layer["dilation"]

    # (B, Cout, Lout_p) bf16: the channel-major flatten is a free reshape;
    # the transpose / narrow / time padding are folded into out_w's rows.
    h = h.reshape(B, -1)

    out_f = bptt * output_size
    out = dense(h, params["out_w"], params["out_b"])[:, :out_f]
    out = out.reshape(B, bptt, output_size)
    return out, None


# ---------------------------------------------------------------------------
# Pure-JAX reference (f32), mirroring the PyTorch module exactly.
# ---------------------------------------------------------------------------
def reference_forward(params, x, bptt, hidden_size, output_size, kernel_size):
    B = x.shape[0]
    h = jnp.transpose(x, (0, 2, 1))
    for layer in params["ref"]["convs"]:
        d = layer["dilation"]
        pad = (kernel_size - 1) * d
        out = jax.lax.conv_general_dilated(
            h, layer["w"], window_strides=(1,), padding=[(pad, pad)],
            rhs_dilation=(d,), dimension_numbers=("NCH", "OIH", "NCH"))
        out = out + layer["b"][None, :, None]
        h = jnp.where(out >= 0, out, 0.01 * out)
    flat = h.reshape(B, -1)[:, :bptt * hidden_size]
    out = flat @ params["ref"]["out_w"].T + params["ref"]["out_b"]
    return out.reshape(B, bptt, output_size)


if __name__ == "__main__":
    # Small shapes consistent with the module's forward.
    B, T = 2, 8
    input_size, hidden_size, output_size = 4, 32, 3
    bptt = T
    kernel_size, dilation, num_layers = 6, 1, 1  # default num_layers=1

    key = jax.random.PRNGKey(0)
    kp, kx = jax.random.split(key)
    params = init_params(kp, input_size, hidden_size, output_size, bptt,
                         kernel_size, dilation, num_layers, seq_len=T)
    x = jax.random.normal(kx, (B, T, input_size), jnp.float32)

    out, hidden = linear_forward(params, x, bptt, hidden_size, output_size)
    out = jax.block_until_ready(out)
    assert out.shape == (B, bptt, output_size)
    assert hidden is None

    ref = jax.block_until_ready(
        reference_forward(params, x, bptt, hidden_size, output_size, kernel_size))
    np.testing.assert_allclose(np.asarray(out, dtype=np.float32),
                               np.asarray(ref, dtype=np.float32),
                               rtol=5e-2, atol=5e-2)
    print("KERNEL_OK")
</pallas_src>

<mosaic_0001>
module attributes {stable_mosaic.version = 11 : i64} {
  func.func @_conv_lrelu_kernel(%arg0: i32, %arg1: memref<1x4x8xf32, #tpu.memory_space<vmem>>, %arg2: memref<6x32x8xbf16, #tpu.memory_space<vmem>>, %arg3: memref<32x1xf32, #tpu.memory_space<vmem>>, %arg4: memref<1x32x128xbf16, #tpu.memory_space<vmem>>, %arg5: memref<8x256xbf16, #tpu.memory_space<vmem>>) attributes {dimension_semantics = [#tpu.dimension_semantics<parallel>], iteration_bounds = array<i64: 2>, scalar_prefetch = 0 : i64, scratch_operands = 1 : i64, tpu.core_type = #tpu.core_type<tc>, window_params = [{transform_indices = @transform_0, window_bounds = array<i64: 1, 4, 8>}, {pipeline_mode = #tpu.pipeline_mode<synchronous>, transform_indices = @transform_1, window_bounds = array<i64: 6, 32, 8>}, {pipeline_mode = #tpu.pipeline_mode<synchronous>, transform_indices = @transform_2, window_bounds = array<i64: 32, 1>}, {transform_indices = @transform_3, window_bounds = array<i64: 1, 32, 128>}]} {
    %cst = arith.constant 0.000000e+00 : bf16
    %0 = vector.broadcast %cst : bf16 to vector<8x256xbf16>
    %c0 = arith.constant 0 : index
    %c0_0 = arith.constant 0 : index
    %1 = vector.load %arg5[%c0, %c0_0] : memref<8x256xbf16, #tpu.memory_space<vmem>>, vector<8x256xbf16>
    tpu.vector_store %arg5[%c0, %c0_0], %0 {strides = array<i32>} : memref<8x256xbf16, #tpu.memory_space<vmem>>, vector<8x256xbf16>,
    %c0_1 = arith.constant 0 : index
    %c0_2 = arith.constant 0 : index
    %c0_3 = arith.constant 0 : index
    %2 = vector.load %arg1[%c0_1, %c0_2, %c0_3] : memref<1x4x8xf32, #tpu.memory_space<vmem>>, vector<1x4x8xf32>
    %3 = vector.shape_cast %2 : vector<1x4x8xf32> to vector<4x8xf32>
    %4 = arith.truncf %3 : vector<4x8xf32> to vector<4x8xbf16>
    %c0_4 = arith.constant 0 : index
    %c5 = arith.constant 5 : index
    %5 = vector.load %arg5[%c0_4, %c5] : memref<8x256xbf16, #tpu.memory_space<vmem>>, vector<4x8xbf16>
    tpu.vector_store %arg5[%c0_4, %c5], %4 {strides = array<i32>} : memref<8x256xbf16, #tpu.memory_space<vmem>>, vector<4x8xbf16>,
    %cst_5 = arith.constant 0.000000e+00 : f32
    %6 = vector.broadcast %cst_5 : f32 to vector<32x128xf32>
    %c0_6 = arith.constant 0 : index
    %c0_7 = arith.constant 0 : index
    %c0_8 = arith.constant 0 : index
    %7 = vector.load %arg2[%c0_6, %c0_7, %c0_8] : memref<6x32x8xbf16, #tpu.memory_space<vmem>>, vector<1x32x8xbf16>
    %8 = vector.shape_cast %7 : vector<1x32x8xbf16> to vector<32x8xbf16>
    %c0_9 = arith.constant 0 : index
    %c0_10 = arith.constant 0 : index
    %9 = vector.load %arg5[%c0_9, %c0_10] : memref<8x256xbf16, #tpu.memory_space<vmem>>, vector<8x128xbf16>
    %cst_11 = arith.constant dense<0.000000e+00> : vector<32x128xf32>
    %10 = tpu.matmul %8, %9, %cst_11 {dimension_numbers = #tpu.dot_dimension_numbers<[1], [0], [0], [1], [0, 0, 1, 1], [], []>} : vector<32x8xbf16>, vector<8x128xbf16>, vector<32x128xf32> -> vector<32x128xf32>
    %11 = arith.addf %6, %10 : vector<32x128xf32>
    %c1 = arith.constant 1 : index
    %c0_12 = arith.constant 0 : index
    %c0_13 = arith.constant 0 : index
    %12 = vector.load %arg2[%c1, %c0_12, %c0_13] : memref<6x32x8xbf16, #tpu.memory_space<vmem>>, vector<1x32x8xbf16>
    %13 = vector.shape_cast %12 : vector<1x32x8xbf16> to vector<32x8xbf16>
    %c0_14 = arith.constant 0 : index
    %c1_15 = arith.constant 1 : index
    %14 = vector.load %arg5[%c0_14, %c1_15] : memref<8x256xbf16, #tpu.memory_space<vmem>>, vector<8x128xbf16>
    %cst_16 = arith.constant dense<0.000000e+00> : vector<32x128xf32>
    %15 = tpu.matmul %13, %14, %cst_16 {dimension_numbers = #tpu.dot_dimension_numbers<[1], [0], [0], [1], [0, 0, 1, 1], [], []>} : vector<32x8xbf16>, vector<8x128xbf16>, vector<32x128xf32> -> vector<32x128xf32>
    %16 = arith.addf %11, %15 : vector<32x128xf32>
    %c2 = arith.constant 2 : index
    %c0_17 = arith.constant 0 : index
    %c0_18 = arith.constant 0 : index
    %17 = vector.load %arg2[%c2, %c0_17, %c0_18] : memref<6x32x8xbf16, #tpu.memory_space<vmem>>, vector<1x32x8xbf16>
    %18 = vector.shape_cast %17 : vector<1x32x8xbf16> to vector<32x8xbf16>
    %c0_19 = arith.constant 0 : index
    %c2_20 = arith.constant 2 : index
    %19 = vector.load %arg5[%c0_19, %c2_20] : memref<8x256xbf16, #tpu.memory_space<vmem>>, vector<8x128xbf16>
    %cst_21 = arith.constant dense<0.000000e+00> : vector<32x128xf32>
    %20 = tpu.matmul %18, %19, %cst_21 {dimension_numbers = #tpu.dot_dimension_numbers<[1], [0], [0], [1], [0, 0, 1, 1], [], []>} : vector<32x8xbf16>, vector<8x128xbf16>, vector<32x128xf32> -> vector<32x128xf32>
    %21 = arith.addf %16, %20 : vector<32x128xf32>
    %c3 = arith.constant 3 : index
    %c0_22 = arith.constant 0 : index
    %c0_23 = arith.constant 0 : index
    %22 = vector.load %arg2[%c3, %c0_22, %c0_23] : memref<6x32x8xbf16, #tpu.memory_space<vmem>>, vector<1x32x8xbf16>
    %23 = vector.shape_cast %22 : vector<1x32x8xbf16> to vector<32x8xbf16>
    %c0_24 = arith.constant 0 : index
    %c3_25 = arith.constant 3 : index
    %24 = vector.load %arg5[%c0_24, %c3_25] : memref<8x256xbf16, #tpu.memory_space<vmem>>, vector<8x128xbf16>
    %cst_26 = arith.constant dense<0.000000e+00> : vector<32x128xf32>
    %25 = tpu.matmul %23, %24, %cst_26 {dimension_numbers = #tpu.dot_dimension_numbers<[1], [0], [0], [1], [0, 0, 1, 1], [], []>} : vector<32x8xbf16>, vector<8x128xbf16>, vector<32x128xf32> -> vector<32x128xf32>
    %26 = arith.addf %21, %25 : vector<32x128xf32>
    %c4 = arith.constant 4 : index
    %c0_27 = arith.constant 0 : index
    %c0_28 = arith.constant 0 : index
    %27 = vector.load %arg2[%c4, %c0_27, %c0_28] : memref<6x32x8xbf16, #tpu.memory_space<vmem>>, vector<1x32x8xbf16>
    %28 = vector.shape_cast %27 : vector<1x32x8xbf16> to vector<32x8xbf16>
    %c0_29 = arith.constant 0 : index
    %c4_30 = arith.constant 4 : index
    %29 = vector.load %arg5[%c0_29, %c4_30] : memref<8x256xbf16, #tpu.memory_space<vmem>>, vector<8x128xbf16>
    %cst_31 = arith.constant dense<0.000000e+00> : vector<32x128xf32>
    %30 = tpu.matmul %28, %29, %cst_31 {dimension_numbers = #tpu.dot_dimension_numbers<[1], [0], [0], [1], [0, 0, 1, 1], [], []>} : vector<32x8xbf16>, vector<8x128xbf16>, vector<32x128xf32> -> vector<32x128xf32>
    %31 = arith.addf %26, %30 : vector<32x128xf32>
    %c5_32 = arith.constant 5 : index
    %c0_33 = arith.constant 0 : index
    %c0_34 = arith.constant 0 : index
    %32 = vector.load %arg2[%c5_32, %c0_33, %c0_34] : memref<6x32x8xbf16, #tpu.memory_space<vmem>>, vector<1x32x8xbf16>
    %33 = vector.shape_cast %32 : vector<1x32x8xbf16> to vector<32x8xbf16>
    %c0_35 = arith.constant 0 : index
    %c5_36 = arith.constant 5 : index
    %34 = vector.load %arg5[%c0_35, %c5_36] : memref<8x256xbf16, #tpu.memory_space<vmem>>, vector<8x128xbf16>
    %cst_37 = arith.constant dense<0.000000e+00> : vector<32x128xf32>
    %35 = tpu.matmul %33, %34, %cst_37 {dimension_numbers = #tpu.dot_dimension_numbers<[1], [0], [0], [1], [0, 0, 1, 1], [], []>} : vector<32x8xbf16>, vector<8x128xbf16>, vector<32x128xf32> -> vector<32x128xf32>
    %36 = arith.addf %31, %35 : vector<32x128xf32>
    %c0_38 = arith.constant 0 : index
    %c0_39 = arith.constant 0 : index
    %37 = vector.load %arg3[%c0_38, %c0_39] : memref<32x1xf32, #tpu.memory_space<vmem>>, vector<32x1xf32>
    %38 = vector.broadcast %37 : vector<32x1xf32> to vector<32x128xf32>
    %39 = arith.addf %36, %38 : vector<32x128xf32>
    %cst_40 = arith.constant 0.000000e+00 : f32
    %40 = vector.broadcast %cst_40 : f32 to vector<32x128xf32>
    %41 = arith.cmpf oge, %39, %40 : vector<32x128xf32>
    %cst_41 = arith.constant 0.00999999977 : f32
    %42 = vector.broadcast %cst_41 : f32 to vector<32x128xf32>
    %43 = arith.mulf %42, %39 : vector<32x128xf32>
    %44 = arith.select %41, %39, %43 : vector<32x128xi1>, vector<32x128xf32>
    %45 = arith.truncf %44 : vector<32x128xf32> to vector<32x128xbf16>
    %c0_42 = arith.constant 0 : index
    %c0_43 = arith.constant 0 : index
    %c0_44 = arith.constant 0 : index
    %46 = vector.load %arg4[%c0_42, %c0_43, %c0_44] : memref<1x32x128xbf16, #tpu.memory_space<vmem>>, vector<1x32x128xbf16>
    %47 = vector.shape_cast %46 : vector<1x32x128xbf16> to vector<32x128xbf16>
    %48 = vector.shape_cast %45 : vector<32x128xbf16> to vector<1x32x128xbf16>
    tpu.vector_store %arg4[%c0_42, %c0_43, %c0_44], %48 {strides = array<i32>} : memref<1x32x128xbf16, #tpu.memory_space<vmem>>, vector<1x32x128xbf16>,
    return
  }
  func.func @transform_0(%arg0: i32) -> (i32, i32, i32) {
    %c0_i32 = arith.constant 0 : i32
    %c0_i32_0 = arith.constant 0 : i32
    %c0_i32_1 = arith.constant 0 : i32
    return %arg0, %c0_i32, %c0_i32_0 : i32, i32, i32
  }
  func.func @transform_1(%arg0: i32) -> (i32, i32, i32) {
    %c0_i32 = arith.constant 0 : i32
    %c0_i32_0 = arith.constant 0 : i32
    %c0_i32_1 = arith.constant 0 : i32
    %c0_i32_2 = arith.constant 0 : i32
    return %c0_i32, %c0_i32_0, %c0_i32_1 : i32, i32, i32
  }
  func.func @transform_2(%arg0: i32) -> (i32, i32) {
    %c0_i32 = arith.constant 0 : i32
    %c0_i32_0 = arith.constant 0 : i32
    %c0_i32_1 = arith.constant 0 : i32
    return %c0_i32, %c0_i32_0 : i32, i32
  }
  func.func @transform_3(%arg0: i32) -> (i32, i32, i32) {
    %c0_i32 = arith.constant 0 : i32
    %c0_i32_0 = arith.constant 0 : i32
    %c0_i32_1 = arith.constant 0 : i32
    return %arg0, %c0_i32, %c0_i32_0 : i32, i32, i32
  }
}

</mosaic_0001>

<bundles_post_ra>
// kernel: tpu_custom_call.1
= control target key start
LH: loop header
LB: loop body
LE: loop exit
PB: predicated region body
PF: predicated region fallthrough
CT: control target
= control target key end

     0   :  { %8 = vsyncpa [#allocation4], 0  ;;  %s1030_s0 = inlined_call_operand.vmem [shape: f32[2,4,8], index: 0, kind: input, shape index: {}]   ;;  %s1031_s1 = inlined_call_operand.vmem [shape: bf16[6,32,8], index: 1, kind: input, shape index: {}]   ;;  %s1032_s2 = inlined_call_operand.vmem [shape: f32[32,1], index: 2, kind: input, shape index: {}]   ;;  %s1033_s3 = inlined_call_operand.hbm [shape: bf16[2,32,128], index: 3, kind: output, shape index: {}]  }
   0x1   :  { %10 = vsyncpa [#allocation4 + $0x1], 0  ;;  %s875_s12 = smov 0   ;;  %s877_s13 = smov 0  }
   0x2   :  { %s879_s14 = smov 0   ;;  %s881_s15 = smov 0  }
   0x3 LB: > { %s896_s16 = sadd.s32 4294967295, %s844_s15   ;;  %s614_s17 = sadd.s32 4294967294, %s844_s15   ;;  %s844_s15 = sphi %s881_s15, %s1039_s15   ;;  %s840_s14 = sphi %s879_s14, %s1038_s14   ;;  %s836_s13 = sphi %s877_s13, %s1037_s13   ;;  %s832_s12 = sphi %s875_s12, %s1036_s12  }
   0x4   : > { %s900_s18 = sadd.s32 1, %s844_s15   ;;  %s91_s19 = sadd.s32 1, %s840_s14 }
   0x5   : > { %s88_s20 = ssub.s32 %s844_s15, %s900_s18  ;;  %p101_p0 = scmp.ne.s32.totalorder %s840_s14, %s836_s13 }
   0x6   : > { %p89_p1 = scmp.eq.s32.totalorder %s88_s20, 0  ;;  %p102_p2 = scmp.eq.s32.totalorder %s896_s16, 1 }
   0x7   : > { %p107_p3 = scmp.ne.s32.totalorder %s836_s13, %s832_s12  ;;  %p108_p4 = scmp.eq.s32.totalorder %s614_s17, 1 }
   0x8   : > { %s911_s21 = scalar_select %p89_p1, %s840_s14, %s91_s19  }
   0x9   : > { %p913_p5 = por %p102_p2, %p101_p0  ;;  %p917_p6 = por %p108_p4, %p107_p3 }
   0xa   : > { %p617_p7 = scmp.ge.s32.totalorder %s844_s15, 1  ;;  %p139_p8 = scmp.lt.s32.totalorder %s844_s15, 3 }
   0xc   : > { %p140_p9 = pnand %p617_p7, %p139_p8 }
   0xd   : > { %p162_p10 = scmp.lt.s32.totalorder (!%p140_p9), %s896_s16, 1  ;;  %s847_s29 = smov (!%p140_p9), 5  }
   0xe   : > { %143 = sbr.rel (%p140_p9) target bundleno = 466 (0x1d2), region = 32  ;;  %s848_s30 = smov (!%p140_p9), 126  }
   0xf   : > { %s849_s4 = smov (!%p140_p9), 127   ;;  %s850_s5 = smov (!%p140_p9), 125  }
  0x10   : > { %s851_s6 = smov (!%p140_p9), 124   ;;  %s852_s7 = smov (!%p140_p9), 123  }
  0x11   : > { %s802_s26 = scalar_lea.hbm (!%p140_p9), %s1033_s3, 32 }
  0x13   : > { %v846_v0 = vmov 0   ;;  %s163_s24 = scalar_select %p162_p10, %s896_s16, 1  ;;  %vm174_vm0 = vcmask 99368   ;;  %vm215_vm1 = vcmask 1043456   ;;  %v706_v11 = vld [vmem:[%s1031_s1 + $0x8] sm:$0xff]  ;;  %vm208_vm2 = vcmask 64512  }
  0x14   : > { %167 = vst [vmem:[#allocation2] sm:$0xff] %v846_v0  ;;  %780 = vset.pattern.permute.xlu0 %v846_v0  ;;  %781 = vset.pattern.permute.xlu1 %v846_v0  ;;  %v705_v12 = vld [vmem:[%s1031_s1] sm:$0xff]  ;;  %vm206_vm3 = vcmask 1039360   ;;  %v708_v18 = vld [vmem:[%s1031_s1 + $0x18] sm:$0xff]  ;;  %v707_v19 = vld [vmem:[%s1031_s1 + $0x10] sm:$0xff]  ;;  %vm295_vm4 = vcmask 1031168  }
  0x15   : > { %779 = vset.pattern.permute.xlu2 %v846_v0  ;;  %s619_s25 = sshll.u32 %s163_s24, 2  ;;  %vm348_vm5 = vcmask 1022976   ;;  %v711_v27 = vld [vmem:[%s1031_s1 + $0x30] sm:$0xff]  ;;  %vm401_vm6 = vcmask 1014784   ;;  %v489_v28 = vld [vmem:[%s1032_s2 + $0x8] sm:$0xff]  ;;  %v488_v30 = vld [vmem:[%s1032_s2] sm:$0xff] }
  0x16   : > { %s165_s28 = scalar_lea.vmem %s1030_s0, %s619_s25  ;;  %v490_v29 = vld [vmem:[%s1032_s2 + $0x10] sm:$0xff]  ;;  %v709_v35 = vld [vmem:[%s1031_s1 + $0x20] sm:$0xff]  ;;  %v491_v37 = vld [vmem:[%s1032_s2 + $0x18] sm:$0xff]  ;;  %vm454_vm7 = vcmask 1006592  }
  0x17   : > { %v168_v1 = vld [vmem:[%s165_s28] sm:$0xf]  ;;  %v715_v42 = vld [vmem:[%s1031_s1 + $0x50] sm:$0xff]  ;;  %v712_v43 = vld [vmem:[%s1031_s1 + $0x38] sm:$0xff] }
  0x18   : > { %v169_v2 = vpack.c.bf16 %v168_v1, %v168_v1  ;;  %v713_v36 = vld [vmem:[%s1031_s1 + $0x40] sm:$0xff]  ;;  %v710_v44 = vld [vmem:[%s1031_s1 + $0x28] sm:$0xff]  ;;  %v716_v46 = vld [vmem:[%s1031_s1 + $0x58] sm:$0xff] }
  0x19   : > { %v714_v45 = vld [vmem:[%s1031_s1 + $0x48] sm:$0xff] }
  0x1a   : > { %171 = vrot.lane.b32.xlu0 %v169_v2, %s847_s29 }
  0x8c   : > { %v172_v3 = vpop.permute.xlu0 %171 }
  0x8d   : > { %175 = vst.msk [vmem:[#allocation2] sm:$0x3] %vm174_vm0, %v172_v3 }
  0x94   : > { %v180_v4 = vld [vmem:[#allocation2] sm:$0xf] }
  0x95   : > { %v186_v5 = vld [vmem:[#allocation2] sm:$0xff]  ;;  %v255_v6 = vsel %vm215_vm1, %v180_v4, 0 }
  0x96   : > { %v199_v7 = vunpack.c.h.b16 %v186_v5  ;;  %v198_v8 = vunpack.c.l.b16 %v186_v5  ;;  %264 = vmatpush.bf16.msra.mxu1 %v255_v6  ;;  %730 = vmatpush.bf16.msra.mxu3 %v255_v6 }
  0x98   : > { %v201_v9 = vpack.c.b16 %v199_v7, %v199_v7  ;;  %v200_v10 = vpack.c.b16 %v198_v8, %v198_v8 }
  0x99   : > { %643 = vmatmul.msk.bf16.vlgmr.msra.gmra.mxu3 %vm208_vm2, %v706_v11  ;;  %642 = vmatmul.msk.bf16.vlgmr.msra.gmra.mxu1 %vm208_vm2, %v705_v12 }
  0x9a   : > { %293 = vrot.lane.b32.xlu2 %v201_v9, %s848_s30  ;;  %204 = vrot.lane.b32.xlu1 %v201_v9, %s849_s4 }
  0x9b   : > { %202 = vrot.lane.b32.xlu0 %v200_v10, %s849_s4  ;;  %s159_s4 = sand.u32 1, %s836_s13  }
  0xa2   : > { %344 = vrot.lane.b32.xlu2 %v200_v10, %s850_s5  ;;  %291 = vrot.lane.b32.xlu1 %v200_v10, %s848_s30 }
  0xa3   : > { %346 = vrot.lane.b32.xlu0 %v201_v9, %s850_s5  ;;  %s618_s5 = sshll.u32 %s159_s4, 4 }
  0xaa   : > { %399 = vrot.lane.b32.xlu2 %v201_v9, %s851_s6  ;;  %397 = vrot.lane.b32.xlu1 %v200_v10, %s851_s6  ;;  %s161_s6 = scalar_lea.vmem [#allocation3], %s618_s5 }
  0xab   : > { %450 = vrot.lane.b32.xlu0 %v200_v10, %s852_s7  ;;  %s549_s11 = sshll.u32 %s161_s6, 4  ;;  %s550_s11 = int_to_ptr.vmem [resolvable:$true] %s549_s11 }
  0xb2   : > { %452 = vrot.lane.b32.xlu1 %v201_v9, %s852_s7  ;;  %494 = vperm.xlu2 %779, %v488_v30   ;;  %s717_s7 = sshll.u32 %s896_s16, 4  ;;  %s537_s16 = scalar_lea.sflag [#allocation4], %s159_s4 }
  0xb3   : > { %499 = vperm.xlu0 %780, %v489_v28   ;;  %s548_s10 = scalar_lea.hbm %s1033_s3, %s717_s7 }
  0xb4   : > { %s551_s17 = sshll.u32 %s548_s10, 4  ;;  %s552_s17 = int_to_ptr.hbm [resolvable:$true] %s551_s17 }
  0xb5   : > { %s796_s19 = sshra.s32 %s552_s17, 4  ;;  %s797_s19 = int_to_ptr.hbm [resolvable:$true] %s796_s19 }
  0xb6   : > { %s798_s20 = scalar_lea.hbm %s797_s19, 16  ;;  %p803_p0 = scmp.lt.s32.totalorder %s797_s19, %s1033_s3 }
  0xb7   : > { %p799_p11 = scmp.ne.s32.totalorder %s797_s19, %s798_s20  ;;  %p804_p1 = scmp.lt.s32.totalorder %s802_s26, %s798_s20 }
  0xb9   : > { %p800_p12 = pnand %p799_p11, %p913_p5  ;;  %p805_p2 = por %p804_p1, %p803_p0 }
  0xba   : > { %504 = vperm.xlu1 %781, %v490_v29   ;;  %509 = vperm.xlu2 %779, %v491_v37  }
  0xbb   : > { %p801_p13 = pneg %p800_p12 }
  0xbd   : > { %p806_p3 = pnand %p805_p2, %p801_p13 }
  0xf4   : > { %v294_v13 = vpop.permute.xlu2 %293 }
  0xfc   : > { %v345_v20 = vpop.permute.xlu2 %344 }
 0x104   : > { %v400_v31 = vpop.permute.xlu2 %399 }
 0x10c   : > { %v205_v14 = vpop.permute.xlu1 %204  ;;  %v495_v5 = vpop.permute.xlu2 %494 }
 0x10d   : > { %v203_v15 = vpop.permute.xlu0 %202 }
 0x10e   : > { %v207_v16 = vsel %vm206_vm3, %v203_v15, %v205_v14 }
 0x10f   : > { %v217_v17 = vsel %vm215_vm1, %v207_v16, 0 }
 0x110   : > { %226 = vmatpush.bf16.msra.mxu0 %v217_v17  ;;  %729 = vmatpush.bf16.msra.mxu2 %v217_v17 }
 0x113   : > { %633 = vmatmul.msk.bf16.vlgmr.msra.gmra.mxu2 %vm208_vm2, %v708_v18  ;;  %632 = vmatmul.msk.bf16.vlgmr.msra.gmra.mxu0 %vm208_vm2, %v707_v19 }
 0x114   : > { %v292_v21 = vpop.permute.xlu1 %291 }
 0x115   : > { %v347_v22 = vpop.permute.xlu0 %346  ;;  %v296_v23 = vsel %vm295_vm4, %v292_v21, %v294_v13 }
 0x116   : > { %v304_v24 = vsel %vm215_vm1, %v296_v23, 0  ;;  %v349_v25 = vsel %vm348_vm5, %v345_v20, %v347_v22  ;;  %v266_v49 = vpop.f32.mrf.mxu1 }
 0x117   : > { %313 = vmatpush.bf16.msrb.mxu2 %v304_v24  ;;  %v357_v26 = vsel %vm215_vm1, %v349_v25, 0 }
 0x118   : > { %366 = vmatpush.bf16.msrb.mxu3 %v357_v26 }
 0x11b   : > { %670 = vmatmul.msk.bf16.vlgmr.msrb.gmra.mxu3 %vm208_vm2, %v711_v27 }
 0x11c   : > { %v398_v32 = vpop.permute.xlu1 %397  ;;  %v271_v47 = vpop.f32.mrf.mxu3 }
 0x11d   : > { %v402_v33 = vsel %vm401_vm6, %v398_v32, %v400_v31  ;;  %v451_v38 = vpop.permute.xlu0 %450 }
 0x11e   : > { %v410_v34 = vsel %vm215_vm1, %v402_v33, 0  ;;  %v268_v54 = vpop.f32.mrf.mxu1 }
 0x11f   : > { %419 = vmatpush.bf16.msrb.mxu0 %v410_v34 }
 0x123   : > { %656 = vmatmul.msk.bf16.vlgmr.msrb.gmra.mxu2 %vm208_vm2, %v709_v35  ;;  %684 = vmatmul.msk.bf16.vlgmr.msrb.gmra.mxu0 %vm208_vm2, %v713_v36 }
 0x124   : > { %v453_v39 = vpop.permute.xlu1 %452  ;;  %v273_v51 = vpop.f32.mrf.mxu3 }
 0x125   : > { %v455_v40 = vsel %vm454_vm7, %v451_v38, %v453_v39  ;;  %v500_v10 = vpop.permute.xlu0 %499  ;;  %v510_v38 = vpop.permute.xlu2 %509 }
 0x126   : > { %v463_v41 = vsel %vm215_vm1, %v455_v40, 0 }
 0x127   : > { %472 = vmatpush.bf16.msrb.mxu1 %v463_v41 }
 0x12a   : > { %698 = vmatmul.msk.bf16.vlgmr.msrb.gmra.mxu1 %vm208_vm2, %v715_v42 }
 0x12b   : > { %671 = vmatmul.msk.bf16.gmra.mxu3 %vm208_vm2, %v712_v43 }
 0x12c   : > { %v505_v30 = vpop.permute.xlu1 %504 }
 0x133   : > { %657 = vmatmul.msk.bf16.gmra.mxu2 %vm208_vm2, %v710_v44  ;;  %685 = vmatmul.msk.bf16.gmra.mxu0 %vm208_vm2, %v714_v45 }
 0x13a   : > { %699 = vmatmul.msk.bf16.gmra.mxu1 %vm208_vm2, %v716_v46 }
 0x190   : > { %v228_v48 = vpop.f32.mrf.mxu0 }
 0x191   : > { %v267_v57 = vadd.f32 %v266_v49, %v228_v48 }
 0x196   : > { %v233_v50 = vpop.f32.mrf.mxu2 }
 0x197   : > { %v272_v11 = vadd.f32 %v271_v47, %v233_v50 }
 0x198   : > { %v230_v52 = vpop.f32.mrf.mxu0 }
 0x199   : > { %v269_v0 = vadd.f32 %v268_v54, %v230_v52 }
 0x19e   : > { %v235_v53 = vpop.f32.mrf.mxu2  ;;  %v368_v55 = vpop.f32.mrf.mxu3 }
 0x19f   : > { %v274_v26 = vadd.f32 %v273_v51, %v235_v53 }
 0x1a0   : > { %v421_v56 = vpop.f32.mrf.mxu0 }
 0x1a6   : > { %v315_v58 = vpop.f32.mrf.mxu2  ;;  %v370_v63 = vpop.f32.mrf.mxu3 }
 0x1a7   : > { %v325_v59 = vadd.f32 %v315_v58, %v267_v57  ;;  %v474_v60 = vpop.f32.mrf.mxu1 }
 0x1a8   : > { %v423_v2 = vpop.f32.mrf.mxu0 }
 0x1a9   : > { %v378_v61 = vadd.f32 %v368_v55, %v325_v59 }
 0x1ab   : > { %v431_v62 = vadd.f32 %v421_v56, %v378_v61 }
 0x1ad   : > { %v484_v3 = vadd.f32 %v474_v60, %v431_v62 }
 0x1ae   : > { %v317_v1 = vpop.f32.mrf.mxu2  ;;  %v373_v14 = vpop.f32.mrf.mxu3 }
 0x1af   : > { %v326_v4 = vadd.f32 %v317_v1, %v269_v0  ;;  %v476_v6 = vpop.f32.mrf.mxu1  ;;  %v512_v8 = vadd.f32 %v495_v5, %v484_v3 }
 0x1b0   : > { %v426_v18 = vpop.f32.mrf.mxu0 }
 0x1b1   : > { %v379_v7 = vadd.f32 %v370_v63, %v326_v4  ;;  %v520_v15 = vmul.f32 0.01, %v512_v8  ;;  %vm516_vm8 = vcmp.ge.f32.partialorder %v512_v8, 0.0 }
 0x1b3   : > { %v432_v9 = vadd.f32 %v423_v2, %v379_v7  ;;  %v524_v22 = vsel %vm516_vm8, %v512_v8, %v520_v15 }
 0x1b5   : > { %v485_v12 = vadd.f32 %v476_v6, %v432_v9 }
 0x1b6   : > { %v320_v13 = vpop.f32.mrf.mxu2  ;;  %v375_v31 = vpop.f32.mrf.mxu3 }
 0x1b7   : > { %v327_v16 = vadd.f32 %v320_v13, %v272_v11  ;;  %v513_v17 = vadd.f32 %v500_v10, %v485_v12  ;;  %v479_v21 = vpop.f32.mrf.mxu1 }
 0x1b8   : > { %v428_v33 = vpop.f32.mrf.mxu0 }
 0x1b9   : > { %vm517_vm9 = vcmp.ge.f32.partialorder %v513_v17, 0.0  ;;  %v521_v19 = vmul.f32 0.01, %v513_v17  ;;  %v380_v20 = vadd.f32 %v373_v14, %v327_v16 }
 0x1bb   : > { %v525_v23 = vsel %vm517_vm9, %v513_v17, %v521_v19  ;;  %v433_v24 = vadd.f32 %v426_v18, %v380_v20 }
 0x1bc   : > { %v721_v25 = vpack.c.bf16 %v525_v23, %v524_v22 }
 0x1bd   : > { %v486_v28 = vadd.f32 %v479_v21, %v433_v24 }
 0x1be   : > { %722 = vst [vmem:[%s161_s6] sm:$0xff] %v721_v25   ;;  %v322_v27 = vpop.f32.mrf.mxu2 }
 0x1bf   : > { %v328_v29 = vadd.f32 %v322_v27, %v274_v26  ;;  %v514_v34 = vadd.f32 %v505_v30, %v486_v28  ;;  %v481_v36 = vpop.f32.mrf.mxu1 }
 0x1c1   : > { %v381_v32 = vadd.f32 %v375_v31, %v328_v29  ;;  %v522_v39 = vmul.f32 0.01, %v514_v34  ;;  %vm518_vm10 = vcmp.ge.f32.partialorder %v514_v34, 0.0 }
 0x1c3   : > { %v434_v35 = vadd.f32 %v428_v33, %v381_v32  ;;  %v526_v42 = vsel %vm518_vm10, %v514_v34, %v522_v39 }
 0x1c5   : > { %v487_v37 = vadd.f32 %v481_v36, %v434_v35 }
 0x1c7   : > { %v515_v40 = vadd.f32 %v510_v38, %v487_v37 }
 0x1c9   : > { %vm519_vm11 = vcmp.ge.f32.partialorder %v515_v40, 0.0  ;;  %v523_v41 = vmul.f32 0.01, %v515_v40 }
 0x1cb   : > { %v527_v43 = vsel %vm519_vm11, %v515_v40, %v523_v41 }
 0x1cc   : > { %v726_v44 = vpack.c.bf16 %v527_v43, %v526_v42 }
 0x1ce   : > { %728 = vst [vmem:[%s161_s6 + $0x8] sm:$0xff] %v726_v44  }
 0x1cf   : > { %809 = shalt.err (!%p806_p3)
}
 0x1d0   : > { %s853_s29 = smov 64   ;;  %s854_s30 = smov 4  }
 0x1d1   : > { %731 = dma.vmem_to_hbm [thread:$0]  (%p913_p5), %s550_s11, 256, %s552_s17, %s537_s16, %s853_s29, %s853_s29, %s854_s30  }
 0x1d2 PF: > { %p737_p4 = scmp.ge.s32.totalorder %s844_s15, 2  ;;  %s566_s4 = sand.u32 1, %s832_s12  }
 0x1d3   : > { %s567_s5 = scalar_lea.sflag [#allocation4], %s566_s4 }
 0x1d4   : > { %p734_p7 = pnand %p737_p4, %p917_p6 }
 0x1d6   : > { %p735_p8 = pneg %p734_p7 }
 0x1d8   : > { %827 = dma.done.wait (%p735_p8), %s567_s5, 256  }
 0x1d9   : > { %829 = vsyncadd (%p735_p8), %s567_s5, 4294967040  ;;  %p13_p9 = scmp.ge.s32.totalorder %s900_s18, 4   ;;  %s1036_s12 = smov %s836_s13 }
 0x1da   : > { %s1037_s13 = smov %s840_s14  ;;  %s1038_s14 = smov %s911_s21 }
 0x1db   : > { %s1039_s15 = smov %s900_s18  ;;  %15 = sbr.rel (!%p13_p9) target bundleno = 3 (0x3), region = 72 }
 0x1e0   :  { %573 = vsyncpa [#allocation4], 1 }
 0x1e1   :  { %575 = vsyncpa [#allocation4 + $0x1], 1 }

</bundles_post_ra>
